<compile_context>
chip_gen: v7x
topology: tpu7x:2x2x1
jax: 0.10.0
libtpu: 0.0.40
codegen_flags: <defaults>
</compile_context>

<pallas_src>
import math
import jax
import jax.numpy as jnp
from jax.experimental import pallas as pl
from jax.experimental.pallas import tpu as pltpu

# ----------------------------- model dims (small, synthetic) -----------------------------
B = 2          # batch
T = 8          # sequence length
D = 32         # feature dim
H = 4          # attention heads
HD = D // H    # head dim
FF = 64        # feed-forward dim
NJ = 24        # SMPL joints (1 global_orient + 23 body_pose)
NBETA = 10
NCAM = 3
NPOSE6D = NJ * 6
P = NPOSE6D + NBETA + NCAM   # 157 head outputs per frame
PPAD = 256                   # lane-dense padded head width

# weight-slab lane offsets (128-aligned segments)
WSLAB_COLS = 640
OFF_WQKV = 0      # (D, 3D)  head-major column order
OFF_WO = 128      # (D, D)
OFF_W1 = 256      # (D, FF)
OFF_HEAD = 384    # (D, PPAD)


def _layernorm(x, gamma, beta, eps=1e-5):
    mu = jnp.mean(x, axis=-1, keepdims=True)
    var = jnp.mean((x - mu) ** 2, axis=-1, keepdims=True)
    return (x - mu) * jax.lax.rsqrt(var + eps) * gamma + beta


# ----------------------------- fused Pallas kernel -----------------------------
def fused_temporal_kernel(x_ref, wslab_ref, w2_ref, vec_ref, out_ref):
    """Transformer encoder layer (MHSA + FFN, post-norm) fused with the SMPL linear head.

    x_ref:     (B, T, D)        f32 input features
    wslab_ref: (D, 640)         bf16 weight slab: [wqkv | wo | w1 | head_w] at 128-aligned offsets
    w2_ref:    (FF, D)          bf16 feed-forward second weight
    vec_ref:   (24, 256)        f32: rows 0..8 biases/LN/head bias, rows 16..23 = -1e9 key mask
                                laid out per (batch, head)
    out_ref:   (B*T, PPAD)      f32 raw SMPL head output (lane-dense)
    """
    f32 = jnp.float32
    bf16 = jnp.bfloat16

    x2d = x_ref[...].reshape(B * T, D)

    # packed parameter vectors (each starts at lane 0 of its own row)
    bqkv = vec_ref[0:1, 0:3 * D]       # head-major order, matches wqkv columns
    b1 = vec_ref[1:2, 0:FF]
    bo = vec_ref[2:3, 0:D]
    b2 = vec_ref[3:4, 0:D]
    g1 = vec_ref[4:5, 0:D]
    be1 = vec_ref[5:6, 0:D]
    g2 = vec_ref[6:7, 0:D]
    be2 = vec_ref[7:8, 0:D]
    head_b = vec_ref[8:9, :]           # (1, PPAD)
    negs = vec_ref[16:16 + B * H, 0:T].reshape(B * H, 1, T)   # -1e9 at padded keys

    # bf16 weight views (static slices of one slab, done once)
    wqkv = wslab_ref[:, OFF_WQKV:OFF_WQKV + 3 * D]
    wo = wslab_ref[:, OFF_WO:OFF_WO + D]
    w1 = wslab_ref[:, OFF_W1:OFF_W1 + FF]
    headw = wslab_ref[:, OFF_HEAD:OFF_HEAD + PPAD]
    w2 = w2_ref[...]

    xb = x2d.astype(bf16)

    # ---- fused Q/K/V projection: one MXU push (bf16 x bf16 -> f32) ----
    qkv = jnp.dot(xb, wqkv, preferred_element_type=f32) + bqkv     # (B*T, 3D), head-major cols
    qkv3 = qkv.reshape(B, T, 3 * D)                                # leading-dim split only

    # ---- stage ONCE into head-batched layout (B*H, T, 3*HD) ----
    # head-major packing => per head a single contiguous lane slice [q_h | k_h | v_h]
    qkvh = jnp.stack(
        [qkv3[:, :, h * 3 * HD:(h + 1) * 3 * HD] for h in range(H)], axis=1
    ).reshape(B * H, T, 3 * HD)

    scale = f32(1.0 / math.sqrt(HD))
    q = (qkvh[..., 0:HD] * scale).astype(bf16)
    k = qkvh[..., HD:2 * HD].astype(bf16)
    v = qkvh[..., 2 * HD:3 * HD].astype(bf16)

    # ---- single batched attention over B*H heads; ONE softmax dependency chain ----
    s = jnp.einsum('bqd,bkd->bqk', q, k, preferred_element_type=f32) + negs
    s = s - jnp.max(s, axis=-1, keepdims=True)
    p = jnp.exp(s)
    p = p * pl.reciprocal(jnp.sum(p, axis=-1, keepdims=True), approx=True)
    o = jnp.einsum('bqk,bkd->bqd', p.astype(bf16), v, preferred_element_type=f32)  # (B*H,T,HD)

    # ---- back to (B*T, D) via one lane concat; ONE full-Wo output projection ----
    o4 = o.reshape(B, H, T, HD)                                    # leading-dim split only
    o2d = jnp.concatenate([o4[:, h] for h in range(H)], axis=-1).reshape(B * T, D)
    attn = jnp.dot(o2d.astype(bf16), wo, preferred_element_type=f32) + bo

    # ---- post-norm residual + ReLU feed-forward (nn.TransformerEncoderLayer default) ----
    h1 = _layernorm(x2d + attn, g1, be1)
    ff = jnp.maximum(jnp.dot(h1.astype(bf16), w1, preferred_element_type=f32) + b1, 0.0)
    ff = jnp.dot(ff.astype(bf16), w2, preferred_element_type=f32) + b2
    feats = _layernorm(h1 + ff, g2, be2)

    # ---- SMPL head: (B*T, D) @ (D, PPAD) + (1, PPAD); full-width lane-dense store ----
    out_ref[...] = jnp.dot(feats.astype(bf16), headw, preferred_element_type=f32) + head_b


# ----------------------------- one-time operand packing (hoisted) -----------------------------
def pack_params(params):
    """Pack all parameters into 3 dense slabs. Called ONCE; never in the per-forward path."""
    bf16 = jnp.bfloat16

    # head-major column permutation for the fused QKV projection:
    # new col = h*(3*HD) + s*HD + d   <-   old col = s*D + h*HD + d   (s in {q,k,v})
    perm = jnp.array([s * D + h * HD + d
                      for h in range(H) for s in range(3) for d in range(HD)], dtype=jnp.int32)
    wqkv = jnp.concatenate([params["wq"], params["wk"], params["wv"]], axis=1)[:, perm]
    bqkv = jnp.concatenate([params["bq"], params["bk"], params["bv"]], axis=1)[:, perm]

    wslab = jnp.zeros((D, WSLAB_COLS), bf16)
    wslab = wslab.at[:, OFF_WQKV:OFF_WQKV + 3 * D].set(wqkv.astype(bf16))
    wslab = wslab.at[:, OFF_WO:OFF_WO + D].set(params["wo"].astype(bf16))
    wslab = wslab.at[:, OFF_W1:OFF_W1 + FF].set(params["w1"].astype(bf16))
    wslab = wslab.at[:, OFF_HEAD:OFF_HEAD + P].set(params["head_w"].astype(bf16))
    w2b = params["w2"].astype(bf16)

    vec = jnp.zeros((24, PPAD), jnp.float32)
    vec = vec.at[0, 0:3 * D].set(bqkv[0])
    vec = vec.at[1, 0:FF].set(params["b1"][0])
    vec = vec.at[2, 0:D].set(params["bo"][0])
    vec = vec.at[3, 0:D].set(params["b2"][0])
    vec = vec.at[4, 0:D].set(params["g1"][0])
    vec = vec.at[5, 0:D].set(params["be1"][0])
    vec = vec.at[6, 0:D].set(params["g2"][0])
    vec = vec.at[7, 0:D].set(params["be2"][0])
    vec = vec.at[8, 0:P].set(params["head_b"][0])
    # rows 16..23: per-(batch, head) key-padding mask * -1e9, filled per call inside the jit.
    return wslab, w2b, vec


# ----------------------------- glue (plain JAX, inside the same jit) -----------------------------
def rot6d_to_rotmat(x6):
    """x6: (..., 6) -> (..., 3, 3) rotation matrices (Gram-Schmidt)."""
    a1, a2 = x6[..., :3], x6[..., 3:]
    b1 = a1 / (jnp.linalg.norm(a1, axis=-1, keepdims=True) + 1e-8)
    a2p = a2 - jnp.sum(b1 * a2, axis=-1, keepdims=True) * b1
    b2 = a2p / (jnp.linalg.norm(a2p, axis=-1, keepdims=True) + 1e-8)
    b3 = jnp.cross(b1, b2)
    return jnp.stack([b1, b2, b3], axis=-1)


def make_temporal_forward(packed):
    """Mirrors TemporalModel.forward(..., compute_loss=False). Whole forward is jit'd."""
    wslab, w2b, vec_base = packed

    @jax.jit
    def forward(x, src_key_padding_mask):
        # fold the per-call key-padding mask into the packed vec slab (one tiny fused update)
        maskneg = src_key_padding_mask.astype(jnp.float32) * jnp.float32(-1e9)   # (B, T)
        maskneg_h = jnp.repeat(maskneg, H, axis=0)                               # (B*H, T)
        vec = vec_base.at[16:16 + B * H, 0:T].set(maskneg_h)

        raw_pad = pl.pallas_call(
            fused_temporal_kernel,
            out_shape=jax.ShapeDtypeStruct((B * T, PPAD), jnp.float32),
            in_specs=[pl.BlockSpec(memory_space=pltpu.MemorySpace.VMEM)] * 4,
            out_specs=pl.BlockSpec(memory_space=pltpu.MemorySpace.VMEM),
        )(x, wslab, w2b, vec)

        raw = raw_pad[:, :P]                                          # (B*T, P)
        pose6d = raw[:, :NPOSE6D].reshape(-1, NJ, 6)
        betas = raw[:, NPOSE6D:NPOSE6D + NBETA]
        pred_cam = raw[:, NPOSE6D + NBETA:NPOSE6D + NBETA + NCAM]

        rotmats = rot6d_to_rotmat(pose6d)                             # (B*T, 24, 3, 3)
        pred_smpl_params = {
            "global_orient": rotmats[:, :1],
            "body_pose": rotmats[:, 1:],
            "betas": betas,
        }
        # TODO(synk): original SMPLHead uses iterative (IEF) refinement and an SMPL mesh model;
        # only a single regression stage is modeled here (compute_loss path not implemented).
        pred_smpl_params_list = [pred_smpl_params]
        return pred_smpl_params, pred_cam, pred_smpl_params_list

    return forward


# ----------------------------- deterministic parameter init -----------------------------
def init_params(key):
    ks = jax.random.split(key, 8)
    s = 0.02
    params = {
        "wq": jax.random.normal(ks[0], (D, D), jnp.float32) * s,
        "wk": jax.random.normal(ks[1], (D, D), jnp.float32) * s,
        "wv": jax.random.normal(ks[2], (D, D), jnp.float32) * s,
        "wo": jax.random.normal(ks[3], (D, D), jnp.float32) * s,
        "bq": jnp.zeros((1, D), jnp.float32),
        "bk": jnp.zeros((1, D), jnp.float32),
        "bv": jnp.zeros((1, D), jnp.float32),
        "bo": jnp.zeros((1, D), jnp.float32),
        "w1": jax.random.normal(ks[4], (D, FF), jnp.float32) * s,
        "b1": jnp.zeros((1, FF), jnp.float32),
        "w2": jax.random.normal(ks[5], (FF, D), jnp.float32) * s,
        "b2": jnp.zeros((1, D), jnp.float32),
        "g1": jnp.ones((1, D), jnp.float32),
        "be1": jnp.zeros((1, D), jnp.float32),
        "g2": jnp.ones((1, D), jnp.float32),
        "be2": jnp.zeros((1, D), jnp.float32),
        "head_w": jax.random.normal(ks[6], (D, P), jnp.float32) * s,
        "head_b": jnp.zeros((1, P), jnp.float32),
    }
    return params


if __name__ == "__main__":
    key = jax.random.PRNGKey(0)
    kx, kp = jax.random.split(key)

    x = jax.random.normal(kx, (B, T, D), jnp.float32)
    # True == padded frame; pad the last two frames of the second sequence.
    src_key_padding_mask = jnp.zeros((B, T), jnp.bool_).at[1, -2:].set(True)

    params = init_params(kp)
    packed = pack_params(params)              # one-time packing, hoisted out of the forward path
    forward = make_temporal_forward(packed)   # jit'd forward

    pred_smpl_params, pred_cam, pred_smpl_params_list = forward(x, src_key_padding_mask)
    jax.block_until_ready((pred_smpl_params, pred_cam))

    assert pred_smpl_params["global_orient"].shape == (B * T, 1, 3, 3)
    assert pred_smpl_params["body_pose"].shape == (B * T, 23, 3, 3)
    assert pred_smpl_params["betas"].shape == (B * T, NBETA)
    assert pred_cam.shape == (B * T, NCAM)
    assert all(jnp.all(jnp.isfinite(v)) for v in
               [pred_smpl_params["global_orient"], pred_smpl_params["body_pose"],
                pred_smpl_params["betas"], pred_cam])

    print("KERNEL_OK")
</pallas_src>

<mosaic_0001>
module attributes {stable_mosaic.version = 11 : i64} {
  func.func @fused_temporal_kernel(%arg0: memref<2x8x32xf32, #tpu.memory_space<vmem>>, %arg1: memref<32x640xbf16, #tpu.memory_space<vmem>>, %arg2: memref<64x32xbf16, #tpu.memory_space<vmem>>, %arg3: memref<24x256xf32, #tpu.memory_space<vmem>>, %arg4: memref<16x256xf32, #tpu.memory_space<vmem>>) attributes {dimension_semantics = [], scalar_prefetch = 0 : i64, scratch_operands = 0 : i64, tpu.core_type = #tpu.core_type<tc>} {
    %c0 = arith.constant 0 : index
    %c0_0 = arith.constant 0 : index
    %c0_1 = arith.constant 0 : index
    %0 = vector.load %arg0[%c0, %c0_0, %c0_1] : memref<2x8x32xf32, #tpu.memory_space<vmem>>, vector<2x8x32xf32>
    %1 = vector.shape_cast %0 : vector<2x8x32xf32> to vector<16x32xf32>
    %c0_2 = arith.constant 0 : index
    %c0_3 = arith.constant 0 : index
    %2 = vector.load %arg3[%c0_2, %c0_3] : memref<24x256xf32, #tpu.memory_space<vmem>>, vector<1x96xf32>
    %c1 = arith.constant 1 : index
    %c0_4 = arith.constant 0 : index
    %3 = vector.load %arg3[%c1, %c0_4] : memref<24x256xf32, #tpu.memory_space<vmem>>, vector<1x64xf32>
    %c2 = arith.constant 2 : index
    %c0_5 = arith.constant 0 : index
    %4 = vector.load %arg3[%c2, %c0_5] : memref<24x256xf32, #tpu.memory_space<vmem>>, vector<1x32xf32>
    %c3 = arith.constant 3 : index
    %c0_6 = arith.constant 0 : index
    %5 = vector.load %arg3[%c3, %c0_6] : memref<24x256xf32, #tpu.memory_space<vmem>>, vector<1x32xf32>
    %c4 = arith.constant 4 : index
    %c0_7 = arith.constant 0 : index
    %6 = vector.load %arg3[%c4, %c0_7] : memref<24x256xf32, #tpu.memory_space<vmem>>, vector<1x32xf32>
    %c5 = arith.constant 5 : index
    %c0_8 = arith.constant 0 : index
    %7 = vector.load %arg3[%c5, %c0_8] : memref<24x256xf32, #tpu.memory_space<vmem>>, vector<1x32xf32>
    %c6 = arith.constant 6 : index
    %c0_9 = arith.constant 0 : index
    %8 = vector.load %arg3[%c6, %c0_9] : memref<24x256xf32, #tpu.memory_space<vmem>>, vector<1x32xf32>
    %c7 = arith.constant 7 : index
    %c0_10 = arith.constant 0 : index
    %9 = vector.load %arg3[%c7, %c0_10] : memref<24x256xf32, #tpu.memory_space<vmem>>, vector<1x32xf32>
    %c8 = arith.constant 8 : index
    %c0_11 = arith.constant 0 : index
    %10 = vector.load %arg3[%c8, %c0_11] : memref<24x256xf32, #tpu.memory_space<vmem>>, vector<1x256xf32>
    %c16 = arith.constant 16 : index
    %c0_12 = arith.constant 0 : index
    %11 = vector.load %arg3[%c16, %c0_12] : memref<24x256xf32, #tpu.memory_space<vmem>>, vector<8x8xf32>
    %12 = vector.shape_cast %11 : vector<8x8xf32> to vector<8x1x8xf32>
    %c0_13 = arith.constant 0 : index
    %c0_14 = arith.constant 0 : index
    %13 = vector.load %arg1[%c0_13, %c0_14] : memref<32x640xbf16, #tpu.memory_space<vmem>>, vector<32x96xbf16>
    %c0_15 = arith.constant 0 : index
    %c128 = arith.constant 128 : index
    %14 = vector.load %arg1[%c0_15, %c128] : memref<32x640xbf16, #tpu.memory_space<vmem>>, vector<32x32xbf16>
    %c0_16 = arith.constant 0 : index
    %c256 = arith.constant 256 : index
    %15 = vector.load %arg1[%c0_16, %c256] : memref<32x640xbf16, #tpu.memory_space<vmem>>, vector<32x64xbf16>
    %c0_17 = arith.constant 0 : index
    %c384 = arith.constant 384 : index
    %16 = vector.load %arg1[%c0_17, %c384] : memref<32x640xbf16, #tpu.memory_space<vmem>>, vector<32x256xbf16>
    %c0_18 = arith.constant 0 : index
    %c0_19 = arith.constant 0 : index
    %17 = vector.load %arg2[%c0_18, %c0_19] : memref<64x32xbf16, #tpu.memory_space<vmem>>, vector<64x32xbf16>
    %18 = arith.truncf %1 : vector<16x32xf32> to vector<16x32xbf16>
    %cst = arith.constant dense<0.000000e+00> : vector<16x96xf32>
    %19 = tpu.matmul %18, %13, %cst {dimension_numbers = #tpu.dot_dimension_numbers<[1], [0], [0], [1], [0, 0, 1, 1], [], []>} : vector<16x32xbf16>, vector<32x96xbf16>, vector<16x96xf32> -> vector<16x96xf32>
    %20 = vector.broadcast %2 : vector<1x96xf32> to vector<16x96xf32>
    %21 = arith.addf %19, %20 : vector<16x96xf32>
    %22 = vector.shape_cast %21 : vector<16x96xf32> to vector<2x8x96xf32>
    %23 = vector.extract_strided_slice %22 {offsets = [0, 0, 0], sizes = [2, 8, 24], strides = [1, 1, 1]} : vector<2x8x96xf32> to vector<2x8x24xf32>
    %24 = vector.extract_strided_slice %22 {offsets = [0, 0, 24], sizes = [2, 8, 24], strides = [1, 1, 1]} : vector<2x8x96xf32> to vector<2x8x24xf32>
    %25 = vector.extract_strided_slice %22 {offsets = [0, 0, 48], sizes = [2, 8, 24], strides = [1, 1, 1]} : vector<2x8x96xf32> to vector<2x8x24xf32>
    %26 = vector.extract_strided_slice %22 {offsets = [0, 0, 72], sizes = [2, 8, 24], strides = [1, 1, 1]} : vector<2x8x96xf32> to vector<2x8x24xf32>
    %27 = vector.shape_cast %23 : vector<2x8x24xf32> to vector<2x1x8x24xf32>
    %28 = vector.shape_cast %24 : vector<2x8x24xf32> to vector<2x1x8x24xf32>
    %29 = vector.shape_cast %25 : vector<2x8x24xf32> to vector<2x1x8x24xf32>
    %30 = vector.shape_cast %26 : vector<2x8x24xf32> to vector<2x1x8x24xf32>
    %31 = tpu.concatenate %27, %28, %29, %30 in 1 : vector<2x1x8x24xf32>, vector<2x1x8x24xf32>, vector<2x1x8x24xf32>, vector<2x1x8x24xf32> -> vector<2x4x8x24xf32>
    %32 = vector.shape_cast %31 : vector<2x4x8x24xf32> to vector<8x8x24xf32>
    %33 = vector.extract_strided_slice %32 {offsets = [0, 0, 0], sizes = [8, 8, 8], strides = [1, 1, 1]} : vector<8x8x24xf32> to vector<8x8x8xf32>
    %cst_20 = arith.constant 0.353553385 : f32
    %34 = vector.broadcast %cst_20 : f32 to vector<8x8x8xf32>
    %35 = arith.mulf %33, %34 : vector<8x8x8xf32>
    %36 = arith.truncf %35 : vector<8x8x8xf32> to vector<8x8x8xbf16>
    %37 = vector.extract_strided_slice %32 {offsets = [0, 0, 8], sizes = [8, 8, 8], strides = [1, 1, 1]} : vector<8x8x24xf32> to vector<8x8x8xf32>
    %38 = arith.truncf %37 : vector<8x8x8xf32> to vector<8x8x8xbf16>
    %39 = vector.extract_strided_slice %32 {offsets = [0, 0, 16], sizes = [8, 8, 8], strides = [1, 1, 1]} : vector<8x8x24xf32> to vector<8x8x8xf32>
    %40 = arith.truncf %39 : vector<8x8x8xf32> to vector<8x8x8xbf16>
    "tpu.trace_start"() <{level = 10 : i32, message = "bqd,bkd->bqk"}> : () -> ()
    %cst_21 = arith.constant dense<0.000000e+00> : vector<8x8x8xf32>
    %41 = tpu.matmul %36, %38, %cst_21 {dimension_numbers = #tpu.dot_dimension_numbers<[2], [2], [1], [1], [0, 0, 0, 1, 1, 1], [0], [0]>} : vector<8x8x8xbf16>, vector<8x8x8xbf16>, vector<8x8x8xf32> -> vector<8x8x8xf32>
    "tpu.trace_stop"() : () -> ()
    %42 = vector.broadcast %12 : vector<8x1x8xf32> to vector<8x8x8xf32>
    %43 = arith.addf %41, %42 : vector<8x8x8xf32>
    %cst_22 = arith.constant dense<0xFF800000> : vector<8x8xf32>
    %44 = vector.multi_reduction <maximumf>, %43, %cst_22 [2] : vector<8x8x8xf32> to vector<8x8xf32>
    %45 = vector.shape_cast %44 : vector<8x8xf32> to vector<8x8x1xf32>
    %46 = vector.broadcast %45 : vector<8x8x1xf32> to vector<8x8x8xf32>
    %47 = arith.subf %43, %46 : vector<8x8x8xf32>
    %48 = math.exp %47 : vector<8x8x8xf32>
    %cst_23 = arith.constant dense<0.000000e+00> : vector<8x8xf32>
    %49 = vector.multi_reduction <add>, %48, %cst_23 [2] : vector<8x8x8xf32> to vector<8x8xf32>
    %50 = vector.shape_cast %49 : vector<8x8xf32> to vector<8x8x1xf32>
    %51 = tpu.reciprocal %50 {approx = true} : vector<8x8x1xf32> -> vector<8x8x1xf32>
    %52 = vector.broadcast %51 : vector<8x8x1xf32> to vector<8x8x8xf32>
    %53 = arith.mulf %48, %52 : vector<8x8x8xf32>
    %54 = arith.truncf %53 : vector<8x8x8xf32> to vector<8x8x8xbf16>
    "tpu.trace_start"() <{level = 10 : i32, message = "bqk,bkd->bqd"}> : () -> ()
    %cst_24 = arith.constant dense<0.000000e+00> : vector<8x8x8xf32>
    %55 = tpu.matmul %54, %40, %cst_24 {dimension_numbers = #tpu.dot_dimension_numbers<[2], [1], [1], [2], [0, 0, 0, 1, 1, 2], [0], [0]>} : vector<8x8x8xbf16>, vector<8x8x8xbf16>, vector<8x8x8xf32> -> vector<8x8x8xf32>
    "tpu.trace_stop"() : () -> ()
    %56 = vector.shape_cast %55 : vector<8x8x8xf32> to vector<2x4x8x8xf32>
    %57 = vector.extract_strided_slice %56 {offsets = [0, 0, 0, 0], sizes = [2, 1, 8, 8], strides = [1, 1, 1, 1]} : vector<2x4x8x8xf32> to vector<2x1x8x8xf32>
    %58 = vector.shape_cast %57 : vector<2x1x8x8xf32> to vector<2x8x8xf32>
    %59 = vector.extract_strided_slice %56 {offsets = [0, 1, 0, 0], sizes = [2, 1, 8, 8], strides = [1, 1, 1, 1]} : vector<2x4x8x8xf32> to vector<2x1x8x8xf32>
    %60 = vector.shape_cast %59 : vector<2x1x8x8xf32> to vector<2x8x8xf32>
    %61 = vector.extract_strided_slice %56 {offsets = [0, 2, 0, 0], sizes = [2, 1, 8, 8], strides = [1, 1, 1, 1]} : vector<2x4x8x8xf32> to vector<2x1x8x8xf32>
    %62 = vector.shape_cast %61 : vector<2x1x8x8xf32> to vector<2x8x8xf32>
    %63 = vector.extract_strided_slice %56 {offsets = [0, 3, 0, 0], sizes = [2, 1, 8, 8], strides = [1, 1, 1, 1]} : vector<2x4x8x8xf32> to vector<2x1x8x8xf32>
    %64 = vector.shape_cast %63 : vector<2x1x8x8xf32> to vector<2x8x8xf32>
    %65 = tpu.concatenate %58, %60, %62, %64 in 2 : vector<2x8x8xf32>, vector<2x8x8xf32>, vector<2x8x8xf32>, vector<2x8x8xf32> -> vector<2x8x32xf32>
    %66 = vector.shape_cast %65 : vector<2x8x32xf32> to vector<16x32xf32>
    %67 = arith.truncf %66 : vector<16x32xf32> to vector<16x32xbf16>
    %cst_25 = arith.constant dense<0.000000e+00> : vector<16x32xf32>
    %68 = tpu.matmul %67, %14, %cst_25 {dimension_numbers = #tpu.dot_dimension_numbers<[1], [0], [0], [1], [0, 0, 1, 1], [], []>} : vector<16x32xbf16>, vector<32x32xbf16>, vector<16x32xf32> -> vector<16x32xf32>
    %69 = vector.broadcast %4 : vector<1x32xf32> to vector<16x32xf32>
    %70 = arith.addf %68, %69 : vector<16x32xf32>
    %71 = arith.addf %1, %70 : vector<16x32xf32>
    %cst_26 = arith.constant dense<0.000000e+00> : vector<16xf32>
    %72 = vector.multi_reduction <add>, %71, %cst_26 [1] : vector<16x32xf32> to vector<16xf32>
    %73 = vector.shape_cast %72 : vector<16xf32> to vector<16x1xf32>
    %cst_27 = arith.constant 3.200000e+01 : f32
    %74 = vector.broadcast %cst_27 : f32 to vector<16x1xf32>
    %75 = arith.divf %73, %74 : vector<16x1xf32>
    %76 = vector.broadcast %75 : vector<16x1xf32> to vector<16x32xf32>
    %77 = arith.subf %71, %76 : vector<16x32xf32>
    %78 = arith.mulf %77, %77 : vector<16x32xf32>
    %cst_28 = arith.constant dense<0.000000e+00> : vector<16xf32>
    %79 = vector.multi_reduction <add>, %78, %cst_28 [1] : vector<16x32xf32> to vector<16xf32>
    %80 = vector.shape_cast %79 : vector<16xf32> to vector<16x1xf32>
    %cst_29 = arith.constant 3.200000e+01 : f32
    %81 = vector.broadcast %cst_29 : f32 to vector<16x1xf32>
    %82 = arith.divf %80, %81 : vector<16x1xf32>
    %83 = vector.broadcast %75 : vector<16x1xf32> to vector<16x32xf32>
    %84 = arith.subf %71, %83 : vector<16x32xf32>
    %cst_30 = arith.constant 9.99999974E-6 : f32
    %85 = vector.broadcast %cst_30 : f32 to vector<16x1xf32>
    %86 = arith.addf %82, %85 : vector<16x1xf32>
    %87 = math.rsqrt %86 : vector<16x1xf32>
    %88 = vector.broadcast %87 : vector<16x1xf32> to vector<16x32xf32>
    %89 = arith.mulf %84, %88 : vector<16x32xf32>
    %90 = vector.broadcast %6 : vector<1x32xf32> to vector<16x32xf32>
    %91 = arith.mulf %89, %90 : vector<16x32xf32>
    %92 = vector.broadcast %7 : vector<1x32xf32> to vector<16x32xf32>
    %93 = arith.addf %91, %92 : vector<16x32xf32>
    %94 = arith.truncf %93 : vector<16x32xf32> to vector<16x32xbf16>
    %cst_31 = arith.constant dense<0.000000e+00> : vector<16x64xf32>
    %95 = tpu.matmul %94, %15, %cst_31 {dimension_numbers = #tpu.dot_dimension_numbers<[1], [0], [0], [1], [0, 0, 1, 1], [], []>} : vector<16x32xbf16>, vector<32x64xbf16>, vector<16x64xf32> -> vector<16x64xf32>
    %96 = vector.broadcast %3 : vector<1x64xf32> to vector<16x64xf32>
    %97 = arith.addf %95, %96 : vector<16x64xf32>
    %cst_32 = arith.constant 0.000000e+00 : f32
    %98 = vector.broadcast %cst_32 : f32 to vector<16x64xf32>
    %99 = arith.maximumf %97, %98 : vector<16x64xf32>
    %100 = arith.truncf %99 : vector<16x64xf32> to vector<16x64xbf16>
    %cst_33 = arith.constant dense<0.000000e+00> : vector<16x32xf32>
    %101 = tpu.matmul %100, %17, %cst_33 {dimension_numbers = #tpu.dot_dimension_numbers<[1], [0], [0], [1], [0, 0, 1, 1], [], []>} : vector<16x64xbf16>, vector<64x32xbf16>, vector<16x32xf32> -> vector<16x32xf32>
    %102 = vector.broadcast %5 : vector<1x32xf32> to vector<16x32xf32>
    %103 = arith.addf %101, %102 : vector<16x32xf32>
    %104 = arith.addf %93, %103 : vector<16x32xf32>
    %cst_34 = arith.constant dense<0.000000e+00> : vector<16xf32>
    %105 = vector.multi_reduction <add>, %104, %cst_34 [1] : vector<16x32xf32> to vector<16xf32>
    %106 = vector.shape_cast %105 : vector<16xf32> to vector<16x1xf32>
    %cst_35 = arith.constant 3.200000e+01 : f32
    %107 = vector.broadcast %cst_35 : f32 to vector<16x1xf32>
    %108 = arith.divf %106, %107 : vector<16x1xf32>
    %109 = vector.broadcast %108 : vector<16x1xf32> to vector<16x32xf32>
    %110 = arith.subf %104, %109 : vector<16x32xf32>
    %111 = arith.mulf %110, %110 : vector<16x32xf32>
    %cst_36 = arith.constant dense<0.000000e+00> : vector<16xf32>
    %112 = vector.multi_reduction <add>, %111, %cst_36 [1] : vector<16x32xf32> to vector<16xf32>
    %113 = vector.shape_cast %112 : vector<16xf32> to vector<16x1xf32>
    %cst_37 = arith.constant 3.200000e+01 : f32
    %114 = vector.broadcast %cst_37 : f32 to vector<16x1xf32>
    %115 = arith.divf %113, %114 : vector<16x1xf32>
    %116 = vector.broadcast %108 : vector<16x1xf32> to vector<16x32xf32>
    %117 = arith.subf %104, %116 : vector<16x32xf32>
    %cst_38 = arith.constant 9.99999974E-6 : f32
    %118 = vector.broadcast %cst_38 : f32 to vector<16x1xf32>
    %119 = arith.addf %115, %118 : vector<16x1xf32>
    %120 = math.rsqrt %119 : vector<16x1xf32>
    %121 = vector.broadcast %120 : vector<16x1xf32> to vector<16x32xf32>
    %122 = arith.mulf %117, %121 : vector<16x32xf32>
    %123 = vector.broadcast %8 : vector<1x32xf32> to vector<16x32xf32>
    %124 = arith.mulf %122, %123 : vector<16x32xf32>
    %125 = vector.broadcast %9 : vector<1x32xf32> to vector<16x32xf32>
    %126 = arith.addf %124, %125 : vector<16x32xf32>
    %127 = arith.truncf %126 : vector<16x32xf32> to vector<16x32xbf16>
    %cst_39 = arith.constant dense<0.000000e+00> : vector<16x256xf32>
    %128 = tpu.matmul %127, %16, %cst_39 {dimension_numbers = #tpu.dot_dimension_numbers<[1], [0], [0], [1], [0, 0, 1, 1], [], []>} : vector<16x32xbf16>, vector<32x256xbf16>, vector<16x256xf32> -> vector<16x256xf32>
    %129 = vector.broadcast %10 : vector<1x256xf32> to vector<16x256xf32>
    %130 = arith.addf %128, %129 : vector<16x256xf32>
    %c0_40 = arith.constant 0 : index
    %c0_41 = arith.constant 0 : index
    %131 = vector.load %arg4[%c0_40, %c0_41] : memref<16x256xf32, #tpu.memory_space<vmem>>, vector<16x256xf32>
    tpu.vector_store %arg4[%c0_40, %c0_41], %130 {strides = array<i32>} : memref<16x256xf32, #tpu.memory_space<vmem>>, vector<16x256xf32>,
    return
  }
}

</mosaic_0001>

<bundles_post_ra>
// kernel: forward.1
= control target key start
LH: loop header
LB: loop body
LE: loop exit
PB: predicated region body
PF: predicated region fallthrough
CT: control target
= control target key end

     0   :  { %v1788_v0 = vmov 0.0   ;;  %vm1789_vm0 = vmmov 0   ;;  %vm118_vm1 = vcmask 261120   ;;  %s1791_s25 = smov 104   ;;  %s1792_s26 = smov 80   ;;  %vm250_vm2 = vcmask 64512   ;;  %s2173_s1 = inlined_call_operand.vmem [shape: bf16[32,640], index: 1, kind: input, shape index: {}]   ;;  %s2174_s0 = inlined_call_operand.vmem [shape: f32[2,8,32], index: 0, kind: input, shape index: {}]   ;;  %s2175_s3 = inlined_call_operand.vmem [shape: f32[24,256], index: 3, kind: input, shape index: {}]   ;;  %s2176_s2 = inlined_call_operand.vmem [shape: bf16[64,32], index: 2, kind: input, shape index: {}]   ;;  %s2177_s4 = inlined_call_operand.vmem [shape: f32[16,256], index: 4, kind: output, shape index: {}]  }
   0x1   :  { %1572 = vmatprep.subr.bf16.mxu0 %v1788_v0  ;;  %v1731_v1 = vld [vmem:[%s2173_s1] ss:$20 sps:$4 sm:$0xff]   ;;  %1576 = vmatprep.mubr.msk.bf16.mxu0 %vm1789_vm0, %v1788_v0  ;;  %v1732_v2 = vld [vmem:[%s2173_s1 + $0x28] ss:$20 sps:$4 sm:$0xff]   ;;  %s1793_s27 = smov 120   ;;  %s1794_s28 = smov 112   ;;  %v36_v63 = vlaneseq }
   0x2   :  { %1580 = vmatprep.subr.bf16.mxu1 %v1788_v0  ;;  %1582 = vmatprep.mubr.msk.bf16.mxu1 %vm1789_vm0, %v1788_v0  ;;  %v1840_v3 = vld [vmem:[%s2174_s0] sm:$0xff]  ;;  %v1845_v4 = vld [vmem:[%s2174_s0 + $0x8] sm:$0xff]  ;;  %s1790_s0 = smov 56   ;;  %vm741_vm3 = vcmask 1043456   ;;  %v1795_v61 = vmov 1966171168  }
   0x3   :  { %1573 = vmatpush3.bf16.msra.mxu0 %v1731_v1  ;;  %v105_v5 = vpack.c.bf16 %v1845_v4, %v1840_v3  ;;  %v20_v6 = vld [vmem:[%s2175_s3] ss:$0 sm:$0xff]  ;;  %v34_v62 = vunpack.c.l.s4 %v1795_v61  ;;  %s1796_s9 = smov 8   ;;  %s1797_s10 = smov 16   ;;  %vm1147_vm4 = vcmask 130048   ;;  %vm1150_vm5 = vcmask 195584  }
   0x4   :  { %1574 = vmatprep.subr.bf16.mxu0 %v1788_v0  ;;  %s1798_s11 = smov 24   ;;  %vm1327_vm6 = vcmask 523264  }
   0x5   :  { %v35_v1 = vunpack.c.0.s8 %v34_v62 }
   0x7   :  { %1575 = vmatpush3.bf16.msra.mxu0 %v1732_v2  ;;  %v1939_v2 = vshrl.u32 %v36_v63, 7 }
   0x8   :  { %1586 = vmatprep.subr.bf16.mxu0 %v1788_v0 }
   0xa   :  { %1577 = vmatmul.mubr.msk.bf16.vlgmr.msra.gmra.mrb[0].mxu0 %vm118_vm1, %v105_v5  ;;  %v38_v5 = vsub.s32 %v35_v1, %v1939_v2 }
   0xb   :  { %1588 = vmatprep.mubr.msk.bf16.mxu0 %vm1789_vm0, %v1788_v0 }
  0xdd   :  { %v156_v7 = vpop.f32.mrb[0].mxu0 }
  0xde   :  { %v157_v8 = vadd.f32 %v156_v7, %v20_v6  ;;  %v1578_v9 = vpop.f32.mrb[1].mxu0 }
  0xdf   :  { %v159_v10 = vpop.f32.mrb[2].mxu0  ;;  %v1946_v9 = vsub.s32 0, %v1939_v2 }
  0xe0   :  { %177 = vrot.lane.b32.xlu1 %v157_v8, %s1790_s0  ;;  %165 = vrot.lane.b32.xlu0 %v157_v8, %s1791_s25  ;;  %v1579_v11 = vpop.f32.mrb[3].mxu0  ;;  %v1857_v12 = vadd.f32 %v159_v10, %v20_v6  ;;  %v199_v13 = vpack.c.bf16 %v157_v8, %v157_v8  ;;  %v183_v29 = vmul.f32 0.35355338, %v157_v8  ;;  %v30_v6 = vld [vmem:[%s2175_s3 + $0x20] sm:$0xff] }
  0xe1   :  { %v39_v7 = vrot.slane %v30_v6, %v38_v5 }
  0xe2   :  { %v1877_v23 = vpack.c.bf16 %v1857_v12, %v1857_v12  ;;  %v191_v30 = vpack.c.bf16 %v183_v29, %v183_v29  ;;  %v187_v46 = vmul.f32 0.35355338, %v1857_v12 }
  0xe4   :  { %171 = vrot.lane.b32.xlu0 %v157_v8, %s1792_s26  ;;  %167 = vrot.lane.b32.xlu1 %v1857_v12, %s1791_s25  ;;  %v195_v50 = vpack.c.bf16 %v187_v46, %v187_v46  ;;  %v55_v8 = vrot.slane %v39_v7, %v38_v5 }
  0xe6   :  { %v210_v10 = vrot.slane %v55_v8, %v1946_v9 }
  0xe8   :  { %173 = vrot.lane.b32.xlu0 %v1857_v12, %s1792_s26  ;;  %179 = vrot.lane.b32.xlu1 %v1857_v12, %s1790_s0 }
  0xec   :  { %248 = vrot.lane.b32.xlu0 %v199_v13, %s1793_s27 }
 0x152   :  { %v178_v14 = vpop.permute.xlu1 %177  ;;  %v166_v15 = vpop.permute.xlu0 %165 }
 0x153   :  { %v1862_v16 = vpack.c.bf16 %v166_v15, %v166_v15  ;;  %v1865_v19 = vpack.c.bf16 %v178_v14, %v178_v14  ;;  %v184_v33 = vmul.f32 0.35355338, %v166_v15  ;;  %v186_v41 = vmul.f32 0.35355338, %v178_v14 }
 0x155   :  { %298 = vrot.lane.b32.xlu1 %v1862_v16, %s1793_s27  ;;  %v192_v37 = vpack.c.bf16 %v184_v33, %v184_v33  ;;  %v194_v45 = vpack.c.bf16 %v186_v41, %v186_v41 }
 0x156   :  { %v172_v17 = vpop.permute.xlu0 %171  ;;  %v168_v18 = vpop.permute.xlu1 %167 }
 0x157   :  { %v1867_v20 = vpack.c.bf16 %v172_v17, %v172_v17  ;;  %v1873_v22 = vpack.c.bf16 %v168_v18, %v168_v18  ;;  %v185_v38 = vmul.f32 0.35355338, %v172_v17  ;;  %v188_v49 = vmul.f32 0.35355338, %v168_v18 }
 0x158   :  { %v47_v18 = vcombine.high %v39_v7, %v39_v7 }
 0x159   :  { %347 = vrot.lane.b32.xlu0 %v1867_v20, %s1793_s27  ;;  %396 = vrot.lane.b32.xlu1 %v1865_v19, %s1793_s27  ;;  %v193_v42 = vpack.c.bf16 %v185_v38, %v185_v38  ;;  %v196_v53 = vpack.c.bf16 %v188_v49, %v188_v49 }
 0x15a   :  { %v1871_v21 = vpop.permute.xlu0 %173  ;;  %v1879_v24 = vpop.permute.xlu1 %179 }
 0x15b   :  { %v1885_v26 = vpack.c.bf16 %v1871_v21, %v1871_v21  ;;  %v1889_v27 = vpack.c.bf16 %v1879_v24, %v1879_v24  ;;  %v189_v54 = vmul.f32 0.35355338, %v1871_v21  ;;  %v190_v58 = vmul.f32 0.35355338, %v1879_v24 }
 0x15c   :  { %v69_v21 = vrot.slane %v47_v18, %v38_v5 }
 0x15d   :  { %494 = vrot.lane.b32.xlu1 %v1873_v22, %s1793_s27  ;;  %445 = vrot.lane.b32.xlu0 %v1877_v23, %s1793_s27  ;;  %v197_v57 = vpack.c.bf16 %v189_v54, %v189_v54  ;;  %v198_v60 = vpack.c.bf16 %v190_v58, %v190_v58 }
 0x15e   :  { %v249_v25 = vpop.permute.xlu0 %248  ;;  %v214_v24 = vrot.slane %v69_v21, %v1946_v9  ;;  %v79_v33 = vcombine.high %v69_v21, %v69_v21 }
 0x15f   :  { %v255_v28 = vsel %vm250_vm2, %v249_v25, 0  ;;  %v77_v25 = vcombine.high %v55_v8, %v55_v8 }
 0x160   :  { %1581 = vmatpush3.bf16.xpose.msra.mxu1 %v255_v28  ;;  %v32_v28 = vcombine.high %v30_v6, %v30_v6  ;;  %v222_v41 = vrot.slane %v79_v33, %v1946_v9 }
 0x161   :  { %592 = vrot.lane.b32.xlu1 %v1889_v27, %s1793_s27  ;;  %543 = vrot.lane.b32.xlu0 %v1885_v26, %s1793_s27 }
 0x162   :  { %1592 = vmatprep.subr.bf16.mxu1 %v1788_v0 }
 0x165   :  { %736 = vrot.lane.b32.xlu1 %v199_v13, %s1794_s28 }
 0x167   :  { %1583 = vmatmul.mubr.msk.bf16.vlgmr.msra.gmra.mrb[0].mxu1 %vm250_vm2, %v191_v30 }
 0x168   :  { %1594 = vmatprep.mubr.msk.bf16.mxu1 %vm1789_vm0, %v1788_v0 }
 0x1c7   :  { %v299_v31 = vpop.permute.xlu1 %298 }
 0x1c8   :  { %v304_v32 = vsel %vm250_vm2, %v299_v31, 0 }
 0x1c9   :  { %1587 = vmatpush3.bf16.xpose.msra.mxu0 %v304_v32  ;;  %v218_v32 = vrot.slane %v77_v25, %v1946_v9 }
 0x1ca   :  { %1598 = vmatprep.subr.bf16.mxu0 %v1788_v0 }
 0x1cb   :  { %v348_v34 = vpop.permute.xlu0 %347  ;;  %v397_v36 = vpop.permute.xlu1 %396 }
 0x1cc   :  { %v353_v35 = vsel %vm250_vm2, %v348_v34, 0  ;;  %v402_v39 = vsel %vm250_vm2, %v397_v36, 0  ;;  %v46_v34 = vrot.slane %v32_v28, %v38_v5 }
 0x1cd   :  { %1593 = vmatpush3.bf16.xpose.msra.mxu1 %v353_v35 }
 0x1ce   :  { %1604 = vmatprep.subr.bf16.mxu1 %v1788_v0 }
 0x1cf   :  { %v446_v40 = vpop.permute.xlu0 %445  ;;  %v495_v44 = vpop.permute.xlu1 %494 }
 0x1d0   :  { %1589 = vmatmul.mubr.msk.bf16.vlgmr.msra.gmra.mrb[4].mxu0 %vm250_vm2, %v192_v37  ;;  %v451_v43 = vsel %vm250_vm2, %v446_v40, 0  ;;  %v500_v47 = vsel %vm250_vm2, %v495_v44, 0 }
 0x1d1   :  { %1599 = vmatpush3.bf16.xpose.msra.mxu0 %v402_v39  ;;  %1600 = vmatprep.mubr.msk.bf16.mxu0 %vm1789_vm0, %v1788_v0 }
 0x1d2   :  { %1610 = vmatprep.subr.bf16.mxu0 %v1788_v0 }
 0x1d3   :  { %v544_v48 = vpop.permute.xlu0 %543  ;;  %v593_v51 = vpop.permute.xlu1 %592 }
 0x1d4   :  { %1595 = vmatmul.mubr.msk.bf16.vlgmr.msra.gmra.mrb[4].mxu1 %vm250_vm2, %v193_v42  ;;  %v549_v52 = vsel %vm250_vm2, %v544_v48, 0  ;;  %v598_v55 = vsel %vm250_vm2, %v593_v51, 0  ;;  %v62_v42 = vrot.slane %v46_v34, %v38_v5 }
 0x1d5   :  { %1605 = vmatpush3.bf16.xpose.msra.mxu1 %v451_v43  ;;  %1606 = vmatprep.mubr.msk.bf16.mxu1 %vm1789_vm0, %v1788_v0  ;;  %v48_v43 = vcombine.high %v46_v34, %v46_v34 }
 0x1d6   :  { %1616 = vmatprep.subr.bf16.mxu1 %v1788_v0 }
 0x1d7   :  { %v737_v56 = vpop.permute.xlu1 %736  ;;  %v76_v51 = vrot.slane %v48_v43, %v38_v5 }
 0x1d8   :  { %1601 = vmatmul.mubr.msk.bf16.vlgmr.msra.gmra.mrb[8].mxu0 %vm250_vm2, %v194_v45  ;;  %v743_v59 = vsel %vm741_vm3, %v737_v56, 0 }
 0x1d9   :  { %1611 = vmatpush3.bf16.xpose.msra.mxu0 %v500_v47  ;;  %1612 = vmatprep.mubr.msk.bf16.mxu0 %vm1789_vm0, %v1788_v0  ;;  %v230_v58 = vrot.slane %v76_v51, %v1946_v9  ;;  %v80_v7 = vcombine.high %v76_v51, %v76_v51 }
 0x1da   :  { %1622 = vmatprep.subr.bf16.mxu0 %v1788_v0 }
 0x1dc   :  { %1607 = vmatmul.mubr.msk.bf16.vlgmr.msra.gmra.mrb[8].mxu1 %vm250_vm2, %v195_v50  ;;  %v226_v50 = vrot.slane %v62_v42, %v1946_v9 }
 0x1dd   :  { %1617 = vmatpush3.bf16.xpose.msra.mxu1 %v549_v52  ;;  %1618 = vmatprep.mubr.msk.bf16.mxu1 %vm1789_vm0, %v1788_v0 }
 0x1de   :  { %1628 = vmatprep.subr.bf16.mxu1 %v1788_v0 }
 0x1e0   :  { %1613 = vmatmul.mubr.msk.bf16.vlgmr.msra.gmra.mrb[12].mxu0 %vm250_vm2, %v196_v53 }
 0x1e1   :  { %1623 = vmatpush3.bf16.xpose.msra.mxu0 %v598_v55  ;;  %1624 = vmatprep.mubr.msk.bf16.mxu0 %vm1789_vm0, %v1788_v0 }
 0x1e2   :  { %1634 = vmatprep.subr.bf16.mxu0 %v1788_v0 }
 0x1e4   :  { %1619 = vmatmul.mubr.msk.bf16.vlgmr.msra.gmra.mrb[12].mxu1 %vm250_vm2, %v197_v57 }
 0x1e5   :  { %1629 = vmatpush3.bf16.msra.mxu1 %v743_v59  ;;  %1630 = vmatprep.mubr.msk.bf16.mxu1 %vm1789_vm0, %v1788_v0  ;;  %v78_v59 = vcombine.high %v62_v42, %v62_v42 }
 0x1e6   :  { %1640 = vmatprep.subr.bf16.mxu1 %v1788_v0 }
 0x1e7   :  { %v234_v6 = vrot.slane %v78_v59, %v1946_v9 }
 0x1e8   :  { %1625 = vmatmul.mubr.msk.bf16.vlgmr.msra.gmra.mrb[16].mxu0 %vm250_vm2, %v198_v60 }
 0x1e9   :  { %1636 = vmatprep.mubr.msk.bf16.mxu0 %vm1789_vm0, %v1788_v0 }
 0x23a   :  { %v291_v11 = vpop.f32.mrb[0].mxu1 }
 0x23b   :  { %v1949_v12 = vadd.f32 %v291_v11, %v210_v10  ;;  %v1584_v13 = vpop.f32.mrb[1].mxu1 }
 0x23c   :  { %v294_v14 = vpop.f32.mrb[2].mxu1 }
 0x23d   :  { %v1585_v15 = vpop.f32.mrb[3].mxu1  ;;  %v640_v17 = vsel %vm250_vm2, %v1949_v12, -inf }
 0x23e   :  { %641 = vmax.xlane.f32.xlu0 %v640_v17  ;;  %v238_v17 = vrot.slane %v80_v7, %v1946_v9 }
 0x2a3   :  { %v340_v29 = vpop.f32.mrb[4].mxu0 }
 0x2a4   :  { %v1954_v30 = vadd.f32 %v340_v29, %v214_v24  ;;  %v1590_v31 = vpop.f32.mrb[5].mxu0 }
 0x2a5   :  { %v343_v35 = vpop.f32.mrb[6].mxu0 }
 0x2a6   :  { %v1591_v36 = vpop.f32.mrb[7].mxu0  ;;  %v643_v37 = vsel %vm250_vm2, %v1954_v30, -inf }
 0x2a7   :  { %v389_v38 = vpop.f32.mrb[4].mxu1  ;;  %644 = vmax.xlane.f32.xlu1 %v643_v37 }
 0x2a8   :  { %v1959_v39 = vadd.f32 %v389_v38, %v218_v32  ;;  %v1596_v40 = vpop.f32.mrb[5].mxu1 }
 0x2a9   :  { %v392_v44 = vpop.f32.mrb[6].mxu1 }
 0x2aa   :  { %v1597_v45 = vpop.f32.mrb[7].mxu1  ;;  %v646_v46 = vsel %vm250_vm2, %v1959_v39, -inf }
 0x2ab   :  { %647 = vmax.xlane.f32.xlu0 %v646_v46  ;;  %v438_v47 = vpop.f32.mrb[8].mxu0 }
 0x2ac   :  { %v439_v48 = vadd.f32 %v438_v47, %v222_v41  ;;  %v1602_v49 = vpop.f32.mrb[9].mxu0 }
 0x2ad   :  { %v441_v52 = vpop.f32.mrb[10].mxu0 }
 0x2ae   :  { %v1603_v53 = vpop.f32.mrb[11].mxu0  ;;  %v649_v54 = vsel %vm250_vm2, %v439_v48, -inf }
 0x2af   :  { %v487_v55 = vpop.f32.mrb[8].mxu1  ;;  %650 = vmax.xlane.f32.xlu0 %v649_v54 }
 0x2b0   :  { %v1966_v56 = vadd.f32 %v487_v55, %v226_v50  ;;  %v1608_v57 = vpop.f32.mrb[9].mxu1 }
 0x2b1   :  { %v490_v60 = vpop.f32.mrb[10].mxu1 }
 0x2b2   :  { %v1609_v61 = vpop.f32.mrb[11].mxu1  ;;  %v652_v62 = vsel %vm250_vm2, %v1966_v56, -inf }
 0x2b3   :  { %653 = vmax.xlane.f32.xlu1 %v652_v62  ;;  %v536_v63 = vpop.f32.mrb[12].mxu0 }
 0x2b4   :  { %v1971_v1 = vadd.f32 %v536_v63, %v230_v58  ;;  %v1614_v5 = vpop.f32.mrb[13].mxu0 }
 0x2b5   :  { %v539_v8 = vpop.f32.mrb[14].mxu0 }
 0x2b6   :  { %v1615_v10 = vpop.f32.mrb[15].mxu0  ;;  %v655_v11 = vsel %vm250_vm2, %v1971_v1, -inf }
 0x2b7   :  { %v585_v13 = vpop.f32.mrb[12].mxu1  ;;  %656 = vmax.xlane.f32.xlu0 %v655_v11 }
 0x2b8   :  { %v586_v14 = vadd.f32 %v585_v13, %v234_v6  ;;  %v1620_v15 = vpop.f32.mrb[13].mxu1 }
 0x2b9   :  { %v588_v18 = vpop.f32.mrb[14].mxu1 }
 0x2ba   :  { %v1621_v21 = vpop.f32.mrb[15].mxu1  ;;  %v658_v24 = vsel %vm250_vm2, %v586_v14, -inf }
 0x2bb   :  { %659 = vmax.xlane.f32.xlu1 %v658_v24  ;;  %v634_v25 = vpop.f32.mrb[16].mxu0 }
 0x2bc   :  { %v635_v28 = vadd.f32 %v634_v25, %v238_v17  ;;  %v1626_v29 = vpop.f32.mrb[17].mxu0 }
 0x2bd   :  { %v637_v31 = vpop.f32.mrb[18].mxu0 }
 0x2be   :  { %v1627_v32 = vpop.f32.mrb[19].mxu0  ;;  %v661_v33 = vsel %vm250_vm2, %v635_v28, -inf }
 0x2bf   :  { %662 = vmax.xlane.f32.xlu0 %v661_v33 }
 0x2cb   :  { %v642_v34 = vpop.xlane.xlu0 %641 }
 0x2cc   :  { %833 = vrot.lane.b32.xlu1 %v1867_v20, %s1794_s28  ;;  %v664_v35 = vsub.f32 %v1949_v12, %v642_v34 }
 0x2ce   :  { %v672_v36 = vmul.f32 1.442695, %v664_v35 }
 0x2d0   :  { %881 = vrot.lane.b32.xlu1 %v1865_v19, %s1794_s28  ;;  %1748 = vpow2.f32 %v672_v36 }
 0x2d5   :  { %785 = vrot.lane.b32.xlu0 %v1862_v16, %s1794_s28 }
 0x2da   :  { %v1986_v37 = vpop.eup %1748 }
 0x2db   :  { %v688_v38 = vsel %vm250_vm2, %v1986_v37, 0.0 }
 0x2f4   :  { %689 = vadd.xlane.f32.xlu1 %v688_v38 }
 0x334   :  { %v645_v40 = vpop.xlane.xlu1 %644 }
 0x335   :  { %v665_v20 = vsub.f32 %v1954_v30, %v645_v40 }
 0x337   :  { %v674_v41 = vmul.f32 1.442695, %v665_v20 }
 0x338   :  { %v648_v42 = vpop.xlane.xlu0 %647 }
 0x339   :  { %1750 = vpow2.f32 %v674_v41  ;;  %v666_v19 = vsub.f32 %v1959_v39, %v648_v42 }
 0x33b   :  { %v676_v16 = vmul.f32 1.442695, %v666_v19 }
 0x33c   :  { %v651_v43 = vpop.xlane.xlu0 %650 }
 0x33d   :  { %1752 = vpow2.f32 %v676_v16  ;;  %v667_v12 = vsub.f32 %v439_v48, %v651_v43 }
 0x33f   :  { %v678_v44 = vmul.f32 1.442695, %v667_v12 }
 0x340   :  { %v654_v53 = vpop.xlane.xlu1 %653 }
 0x341   :  { %1754 = vpow2.f32 %v678_v44  ;;  %v668_v54 = vsub.f32 %v1966_v56, %v654_v53 }
 0x343   :  { %v1992_v45 = vpop.eup %1750  ;;  %v680_v58 = vmul.f32 1.442695, %v668_v54 }
 0x344   :  { %v691_v46 = vsel %vm250_vm2, %v1992_v45, 0.0  ;;  %v657_v30 = vpop.xlane.xlu0 %656 }
 0x345   :  { %692 = vadd.xlane.f32.xlu0 %v691_v46  ;;  %v669_v57 = vsub.f32 %v1971_v1, %v657_v30  ;;  %1756 = vpow2.f32 %v680_v58 }
 0x347   :  { %v1996_v47 = vpop.eup %1752  ;;  %v682_v60 = vmul.f32 1.442695, %v669_v57 }
 0x348   :  { %v694_v49 = vsel %vm250_vm2, %v1996_v47, 0.0  ;;  %v660_v55 = vpop.xlane.xlu1 %659 }
 0x349   :  { %695 = vadd.xlane.f32.xlu1 %v694_v49  ;;  %v670_v59 = vsub.f32 %v586_v14, %v660_v55  ;;  %1758 = vpow2.f32 %v682_v60 }
 0x34b   :  { %v2000_v39 = vpop.eup %1754  ;;  %v684_v61 = vmul.f32 1.442695, %v670_v59 }
 0x34c   :  { %v663_v50 = vpop.xlane.xlu0 %662  ;;  %v697_v48 = vsel %vm250_vm2, %v2000_v39, 0.0  ;;  %v834_v5 = vpop.permute.xlu1 %833 }
 0x34d   :  { %698 = vadd.xlane.f32.xlu0 %v697_v48  ;;  %v671_v62 = vsub.f32 %v635_v28, %v663_v50  ;;  %1760 = vpow2.f32 %v684_v61  ;;  %v839_v18 = vsel %vm741_vm3, %v834_v5, 0 }
 0x34f   :  { %v686_v63 = vmul.f32 1.442695, %v671_v62 }
 0x350   :  { %v786_v51 = vpop.permute.xlu0 %785  ;;  %v882_v6 = vpop.permute.xlu1 %881 }
 0x351   :  { %v791_v52 = vsel %vm741_vm3, %v786_v51, 0  ;;  %1762 = vpow2.f32 %v686_v63  ;;  %v887_v33 = vsel %vm741_vm3, %v882_v6, 0 }
 0x352   :  { %1635 = vmatpush3.bf16.msra.mxu0 %v791_v52 }
 0x353   :  { %1646 = vmatprep.subr.bf16.mxu0 %v1788_v0 }
 0x35a   :  { %977 = vrot.lane.b32.xlu1 %v1873_v22, %s1794_s28  ;;  %v2012_v22 = vpop.eup %1756 }
 0x35b   :  { %v700_v56 = vsel %vm250_vm2, %v2012_v22, 0.0 }
 0x363   :  { %929 = vrot.lane.b32.xlu0 %v1877_v23, %s1794_s28  ;;  %v2014_v23 = vpop.eup %1758 }
 0x364   :  { %v2018_v1 = vpop.eup %1760  ;;  %v703_v10 = vsel %vm250_vm2, %v2014_v23, 0.0 }
 0x365   :  { %v706_v8 = vsel %vm250_vm2, %v2018_v1, 0.0  ;;  %v2024_v11 = vpop.eup %1762 }
 0x366   :  { %v709_v13 = vsel %vm250_vm2, %v2024_v11, 0.0 }
 0x37e   :  { %701 = vadd.xlane.f32.xlu1 %v700_v56 }
 0x381   :  { %v690_v7 = vpop.xlane.xlu1 %689 }
 0x382   :  { %1764 = vrcp.f32 %v690_v7  ;;  %707 = vadd.xlane.f32.xlu1 %v706_v8  ;;  %704 = vadd.xlane.f32.xlu0 %v703_v10 }
 0x386   :  { %710 = vadd.xlane.f32.xlu0 %v709_v13  ;;  %v1734_v13 = vld [vmem:[%s2173_s1 + $0x4] ss:$20 sps:$4 sm:$0xff]  }
 0x38c   :  { %v1765_v14 = vpop.eup %1764 }
 0x38d   :  { %v720_v15 = vmul.f32 %v1765_v14, %v1986_v37 }
 0x38f   :  { %v728_v17 = vpack.c.bf16 %v720_v15, %v720_v15 }
 0x391   :  { %1631 = vmatmul.mubr.msk.bf16.vlgmr.msra.gmra.mrb[16].mxu1 %vm250_vm2, %v728_v17 }
 0x392   :  { %1641 = vmatpush3.bf16.msra.mxu1 %v839_v18  ;;  %1642 = vmatprep.mubr.msk.bf16.mxu1 %vm1789_vm0, %v1788_v0  ;;  %v1735_v18 = vld [vmem:[%s2173_s1 + $0x2c] ss:$20 sps:$4 sm:$0xff]  }
 0x393   :  { %1073 = vrot.lane.b32.xlu1 %v1889_v27, %s1794_s28  ;;  %1652 = vmatprep.subr.bf16.mxu1 %v1788_v0 }
 0x39c   :  { %1025 = vrot.lane.b32.xlu0 %v1885_v26, %s1794_s28 }
 0x3d2   :  { %v693_v21 = vpop.xlane.xlu0 %692 }
 0x3d3   :  { %1766 = vrcp.f32 %v693_v21 }
 0x3d6   :  { %v696_v24 = vpop.xlane.xlu1 %695 }
 0x3d7   :  { %1768 = vrcp.f32 %v696_v24 }
 0x3da   :  { %v699_v25 = vpop.xlane.xlu0 %698  ;;  %v978_v38 = vpop.permute.xlu1 %977 }
 0x3db   :  { %1770 = vrcp.f32 %v699_v25  ;;  %v983_v20 = vsel %vm741_vm3, %v978_v38, 0 }
 0x3dd   :  { %v1767_v28 = vpop.eup %1766 }
 0x3de   :  { %v721_v29 = vmul.f32 %v1767_v28, %v1992_v45  ;;  %v930_v34 = vpop.permute.xlu0 %929 }
 0x3df   :  { %v935_v37 = vsel %vm741_vm3, %v930_v34, 0 }
 0x3e0   :  { %v729_v31 = vpack.c.bf16 %v721_v29, %v721_v29 }
 0x3e1   :  { %v1769_v32 = vpop.eup %1768 }
 0x3e2   :  { %v722_v27 = vmul.f32 %v1769_v32, %v1996_v47  ;;  %1637 = vmatmul.mubr.msk.bf16.vlgmr.msra.gmra.mrb[20].mxu0 %vm250_vm2, %v729_v31 }
 0x3e3   :  { %1647 = vmatpush3.bf16.msra.mxu0 %v887_v33  ;;  %1648 = vmatprep.mubr.msk.bf16.mxu0 %vm1789_vm0, %v1788_v0 }
 0x3e4   :  { %v730_v26 = vpack.c.bf16 %v722_v27, %v722_v27  ;;  %1658 = vmatprep.subr.bf16.mxu0 %v1788_v0 }
 0x3e5   :  { %v1771_v35 = vpop.eup %1770 }
 0x3e6   :  { %v723_v36 = vmul.f32 %v1771_v35, %v2000_v39  ;;  %1643 = vmatmul.mubr.msk.bf16.vlgmr.msra.gmra.mrb[20].mxu1 %vm250_vm2, %v730_v26 }
 0x3e7   :  { %1653 = vmatpush3.bf16.msra.mxu1 %v935_v37  ;;  %1654 = vmatprep.mubr.msk.bf16.mxu1 %vm1789_vm0, %v1788_v0 }
 0x3e8   :  { %v731_v40 = vpack.c.bf16 %v723_v36, %v723_v36  ;;  %1664 = vmatprep.subr.bf16.mxu1 %v1788_v0 }
 0x3ea   :  { %1649 = vmatmul.mubr.msk.bf16.vlgmr.msra.gmra.mrb[24].mxu0 %vm250_vm2, %v731_v40 }
 0x3eb   :  { %1659 = vmatpush3.bf16.msra.mxu0 %v983_v20  ;;  %1660 = vmatprep.mubr.msk.bf16.mxu0 %vm1789_vm0, %v1788_v0 }
 0x3ec   :  { %1670 = vmatprep.subr.bf16.mxu0 %v1788_v0 }
 0x40b   :  { %v702_v41 = vpop.xlane.xlu1 %701 }
 0x40c   :  { %1772 = vrcp.f32 %v702_v41 }
 0x40f   :  { %v708_v42 = vpop.xlane.xlu1 %707  ;;  %v705_v19 = vpop.xlane.xlu0 %704 }
 0x410   :  { %1774 = vrcp.f32 %v708_v42 }
 0x411   :  { %1776 = vrcp.f32 %v705_v19 }
 0x413   :  { %v711_v16 = vpop.xlane.xlu0 %710  ;;  %v1074_v50 = vpop.permute.xlu1 %1073 }
 0x414   :  { %1778 = vrcp.f32 %v711_v16  ;;  %v1079_v52 = vsel %vm741_vm3, %v1074_v50, 0 }
 0x416   :  { %v1773_v43 = vpop.eup %1772 }
 0x417   :  { %v724_v12 = vmul.f32 %v1773_v43, %v2012_v22  ;;  %v1026_v44 = vpop.permute.xlu0 %1025 }
 0x418   :  { %v1031_v30 = vsel %vm741_vm3, %v1026_v44, 0 }
 0x419   :  { %v732_v45 = vpack.c.bf16 %v724_v12, %v724_v12 }
 0x41a   :  { %v1775_v46 = vpop.eup %1774 }
 0x41b   :  { %v1777_v47 = vpop.eup %1776  ;;  %1655 = vmatmul.mubr.msk.bf16.vlgmr.msra.gmra.mrb[24].mxu1 %vm250_vm2, %v732_v45  ;;  %v726_v39 = vmul.f32 %v1775_v46, %v2018_v1 }
 0x41c   :  { %v725_v49 = vmul.f32 %v1777_v47, %v2014_v23  ;;  %1665 = vmatpush3.bf16.msra.mxu1 %v1031_v30  ;;  %1666 = vmatprep.mubr.msk.bf16.mxu1 %vm1789_vm0, %v1788_v0 }
 0x41d   :  { %1676 = vmatprep.subr.bf16.mxu1 %v1788_v0  ;;  %v734_v53 = vpack.c.bf16 %v726_v39, %v726_v39 }
 0x41e   :  { %v733_v48 = vpack.c.bf16 %v725_v49, %v725_v49  ;;  %v1779_v51 = vpop.eup %1778 }
 0x41f   :  { %v727_v54 = vmul.f32 %v1779_v51, %v2024_v11 }
 0x420   :  { %1661 = vmatmul.mubr.msk.bf16.vlgmr.msra.gmra.mrb[28].mxu0 %vm250_vm2, %v733_v48  ;;  %v22_v48 = vld [vmem:[%s2175_s3 + $0x2] ss:$0 sm:$0xff] }
 0x421   :  { %1671 = vmatpush3.bf16.msra.mxu0 %v1079_v52  ;;  %1672 = vmatprep.mubr.msk.bf16.mxu0 %vm1789_vm0, %v1788_v0  ;;  %v735_v55 = vpack.c.bf16 %v727_v54, %v727_v54 }
 0x422   :  { %1684 = vmatprep.subr.bf16.mxu0 %v1788_v0 }
 0x423   :  { %1667 = vmatmul.mubr.msk.bf16.vlgmr.msra.gmra.mrb[28].mxu1 %vm250_vm2, %v734_v53 }
 0x424   :  { %1680 = vmatprep.mubr.msk.bf16.mxu1 %vm1789_vm0, %v1788_v0  ;;  %1677 = vmatpush3.bf16.msra.mxu1 %v1734_v13 }
 0x425   :  { %1678 = vmatprep.subr.bf16.mxu1 %v1788_v0 }
 0x428   :  { %1673 = vmatmul.mubr.msk.bf16.vlgmr.msra.gmra.mrb[32].mxu0 %vm250_vm2, %v735_v55  ;;  %1679 = vmatpush3.bf16.msra.mxu1 %v1735_v18 }
 0x429   :  { %1688 = vmatprep.mubr.msk.bf16.mxu0 %vm1789_vm0, %v1788_v0  ;;  %1692 = vmatprep.subr.bf16.mxu1 %v1788_v0 }
 0x464   :  { %v779_v57 = vpop.f32.mrb[16].mxu1 }
 0x465   :  { %v1632_v58 = vpop.f32.mrb[17].mxu1 }
 0x466   :  { %v782_v59 = vpop.f32.mrb[18].mxu1 }
 0x467   :  { %v1633_v60 = vpop.f32.mrb[19].mxu1 }
 0x4b5   :  { %v827_v61 = vpop.f32.mrb[20].mxu0 }
 0x4b6   :  { %v1638_v62 = vpop.f32.mrb[21].mxu0 }
 0x4b7   :  { %v830_v63 = vpop.f32.mrb[22].mxu0 }
 0x4b8   :  { %v1639_v5 = vpop.f32.mrb[23].mxu0 }
 0x4b9   :  { %v875_v22 = vpop.f32.mrb[20].mxu1 }
 0x4ba   :  { %v1644_v23 = vpop.f32.mrb[21].mxu1 }
 0x4bb   :  { %v878_v6 = vpop.f32.mrb[22].mxu1 }
 0x4bc   :  { %v1645_v56 = vpop.f32.mrb[23].mxu1 }
 0x4bd   :  { %v923_v1 = vpop.f32.mrb[24].mxu0 }
 0x4be   :  { %v1650_v7 = vpop.f32.mrb[25].mxu0 }
 0x4bf   :  { %v926_v8 = vpop.f32.mrb[26].mxu0 }
 0x4c0   :  { %v1651_v10 = vpop.f32.mrb[27].mxu0  ;;  %v1737_v8 = vld [vmem:[%s2173_s1 + $0x30] ss:$20 sps:$4 sm:$0xff]  }
 0x4c1   :  { %v1738_v10 = vld [vmem:[%s2176_s2] sm:$0xff]  }
 0x4ee   :  { %v971_v11 = vpop.f32.mrb[24].mxu1 }
 0x4ef   :  { %v1656_v14 = vpop.f32.mrb[25].mxu1 }
 0x4f0   :  { %v974_v15 = vpop.f32.mrb[26].mxu1 }
 0x4f1   :  { %v1657_v17 = vpop.f32.mrb[27].mxu1 }
 0x4f3   :  { %v1019_v21 = vpop.f32.mrb[28].mxu0 }
 0x4f4   :  { %v1716_v24 = vpack.i.bf16 %v1019_v21, %v827_v61  ;;  %v1662_v25 = vpop.f32.mrb[29].mxu0 }
 0x4f5   :  { %v1022_v28 = vpop.f32.mrb[30].mxu0  ;;  %v24_v25 = vld [vmem:[%s2175_s3 + $0x4] ss:$0 sm:$0xff] }
 0x4f6   :  { %1717 = vrot.lane.b32.xlu0 %v1716_v24, %s1796_s9  ;;  %v1663_v29 = vpop.f32.mrb[31].mxu0  ;;  %v1067_v31 = vpop.f32.mrb[28].mxu1 }
 0x4f7   :  { %v1721_v32 = vpack.i.bf16 %v1067_v31, %v875_v22  ;;  %v1668_v33 = vpop.f32.mrb[29].mxu1 }
 0x4f8   :  { %v1070_v27 = vpop.f32.mrb[30].mxu1  ;;  %v25_v33 = vld [vmem:[%s2175_s3 + $0x5] ss:$0 sm:$0xff] }
 0x4f9   :  { %1722 = vrot.lane.b32.xlu1 %v1721_v32, %s1797_s10  ;;  %v1669_v34 = vpop.f32.mrb[31].mxu1 }
 0x4fb   :  { %v1115_v26 = vpop.f32.mrb[32].mxu0 }
 0x4fc   :  { %v1726_v35 = vpack.i.bf16 %v1115_v26, %v923_v1  ;;  %v1674_v36 = vpop.f32.mrb[33].mxu0 }
 0x4fd   :  { %v1118_v37 = vpop.f32.mrb[34].mxu0  ;;  %v1740_v36 = vld [vmem:[%s2176_s2 + $0x10] sm:$0xff]  }
 0x4fe   :  { %1727 = vrot.lane.b32.xlu0 %v1726_v35, %s1798_s11  ;;  %v1675_v38 = vpop.f32.mrb[35].mxu0  ;;  %v1741_v37 = vld [vmem:[%s2176_s2 + $0x18] sm:$0xff]  }
 0x4ff   :  { %v21_v38 = vld [vmem:[%s2175_s3 + $0x1] ss:$0 sm:$0xff] }
 0x568   :  { %v1718_v40 = vpop.permute.xlu0 %1717 }
 0x569   :  { %v1720_v41 = vunpack.i.h.bf16 %v1718_v40  ;;  %v1719_v42 = vunpack.i.l.bf16 %v1718_v40 }
 0x56b   :  { %v1723_v20 = vpop.permute.xlu1 %1722  ;;  %v1146_v12 = vsel %vm250_vm2, %v971_v11, %v1720_v41  ;;  %v1145_v44 = vsel %vm250_vm2, %v779_v57, %v1719_v42  ;;  %v1739_v11 = vld [vmem:[%s2176_s2 + $0x8] sm:$0xff]  }
 0x56c   :  { %v1725_v19 = vunpack.i.h.bf16 %v1723_v20  ;;  %v1724_v16 = vunpack.i.l.bf16 %v1723_v20 }
 0x56e   :  { %v1148_v47 = vsel %vm1147_vm4, %v1145_v44, %v1724_v16  ;;  %v1149_v30 = vsel %vm1147_vm4, %v1146_v12, %v1725_v19 }
 0x570   :  { %v1728_v43 = vpop.permute.xlu0 %1727 }
 0x571   :  { %v1730_v45 = vunpack.i.h.bf16 %v1728_v43  ;;  %v1729_v46 = vunpack.i.l.bf16 %v1728_v43 }
 0x573   :  { %v1152_v49 = vsel %vm1150_vm5, %v1149_v30, %v1730_v45  ;;  %v1151_v39 = vsel %vm1150_vm5, %v1148_v47, %v1729_v46 }
 0x574   :  { %v1153_v50 = vpack.c.bf16 %v1152_v49, %v1151_v39 }
 0x576   :  { %1681 = vmatmul.mubr.msk.bf16.vlgmr.msra.gmra.mrb[32].mxu1 %vm118_vm1, %v1153_v50 }
 0x577   :  { %1700 = vmatprep.mubr.msk.bf16.mxu1 %vm1789_vm0, %v1788_v0  ;;  %1693 = vmatpush3.bf16.msra.mxu1 %v1738_v10 }
 0x578   :  { %1694 = vmatprep.subr.bf16.mxu1 %v1788_v0 }
 0x57b   :  { %1695 = vmatpush3.bf16.msra.mxu1 %v1739_v11 }
 0x57c   :  { %1696 = vmatprep.subr.bf16.mxu1 %v1788_v0 }
 0x57f   :  { %1697 = vmatpush3.bf16.msra.mxu1 %v1740_v36 }
 0x580   :  { %1698 = vmatprep.subr.bf16.mxu1 %v1788_v0 }
 0x583   :  { %1699 = vmatpush3.bf16.msra.mxu1 %v1741_v37 }
 0x649   :  { %v1203_v51 = vpop.f32.mrb[32].mxu1 }
 0x64a   :  { %v1204_v52 = vadd.f32 %v1203_v51, %v22_v48  ;;  %v1682_v53 = vpop.f32.mrb[33].mxu1 }
 0x64b   :  { %v1206_v54 = vpop.f32.mrb[34].mxu1 }
 0x64c   :  { %v1207_v55 = vadd.f32 %v1206_v54, %v22_v48  ;;  %v1683_v57 = vpop.f32.mrb[35].mxu1  ;;  %v1210_v58 = vadd.f32 %v1204_v52, %v1840_v3 }
 0x64e   :  { %v1212_v59 = vsel %vm118_vm1, %v1210_v58, 0.0  ;;  %v1211_v60 = vadd.f32 %v1207_v55, %v1845_v4  ;;  %v1736_v4 = vld [vmem:[%s2173_s1 + $0x8] ss:$20 sps:$4 sm:$0xff]  }
 0x64f   :  { %1213 = vadd.xlane.f32.xlu1 %v1212_v59  ;;  %1685 = vmatpush3.bf16.msra.mxu0 %v1736_v4 }
 0x650   :  { %v1215_v61 = vsel %vm118_vm1, %v1211_v60, 0.0  ;;  %1686 = vmatprep.subr.bf16.mxu0 %v1788_v0  ;;  %v23_v0 = vld [vmem:[%s2175_s3 + $0x3] ss:$0 sm:$0xff] }
 0x651   :  { %1216 = vadd.xlane.f32.xlu0 %v1215_v61 }
 0x653   :  { %1687 = vmatpush3.bf16.msra.mxu0 %v1737_v8 }
 0x6dc   :  { %v1214_v62 = vpop.xlane.xlu1 %1213 }
 0x6dd   :  { %v1219_v63 = vmul.f32 0.03125, %v1214_v62 }
 0x6de   :  { %v1217_v5 = vpop.xlane.xlu0 %1216 }
 0x6df   :  { %v1221_v22 = vsub.f32 %v1210_v58, %v1219_v63  ;;  %v1220_v23 = vmul.f32 0.03125, %v1217_v5  ;;  %v1744_v5 = vld [vmem:[%s2173_s1 + $0x10] ss:$20 sps:$4 sm:$0xff]  }
 0x6e0   :  { %1439 = vmatprep.subr.bf16.mxu0 %v1744_v5 }
 0x6e1   :  { %v1222_v6 = vsub.f32 %v1211_v60, %v1220_v23  ;;  %v1223_v56 = vmul.f32 %v1221_v22, %v1221_v22  ;;  %v1745_v23 = vld [vmem:[%s2173_s1 + $0x34] ss:$20 sps:$4 sm:$0xff]  }
 0x6e3   :  { %v1225_v1 = vsel %vm118_vm1, %v1223_v56, 0.0  ;;  %v1224_v7 = vmul.f32 %v1222_v6, %v1222_v6  ;;  %v1799_v56 = vmov 0  }
 0x6e4   :  { %1226 = vadd.xlane.f32.xlu0 %v1225_v1 }
 0x6e5   :  { %v1228_v3 = vsel %vm118_vm1, %v1224_v7, 0.0 }
 0x6e6   :  { %1229 = vadd.xlane.f32.xlu1 %v1228_v3 }
 0x771   :  { %v1227_v13 = vpop.xlane.xlu0 %1226 }
 0x772   :  { %v1231_v14 = vmul.f32 0.03125, %v1227_v13  ;;  %v26_v13 = vld [vmem:[%s2175_s3 + $0x6] ss:$0 sm:$0xff] }
 0x773   :  { %v1230_v15 = vpop.xlane.xlu1 %1229 }
 0x774   :  { %v1233_v17 = vadd.f32 1e-05, %v1231_v14  ;;  %v1232_v18 = vmul.f32 0.03125, %v1230_v15 }
 0x776   :  { %1780 = vrsqrt.f32 %v1233_v17  ;;  %v1234_v21 = vadd.f32 1e-05, %v1232_v18 }
 0x778   :  { %1782 = vrsqrt.f32 %v1234_v21  ;;  %v27_v21 = vld [vmem:[%s2175_s3 + $0x7] ss:$0 sm:$0xff] }
 0x780   :  { %v1781_v24 = vpop.eup %1780 }
 0x781   :  { %v1237_v28 = vmul.f32 %v1781_v24, %v1221_v22  ;;  %v1742_v22 = vld [vmem:[%s2173_s1 + $0xc] ss:$20 sps:$4 sm:$0xff]  }
 0x782   :  { %v1783_v29 = vpop.eup %1782 }
 0x783   :  { %v1239_v31 = vmul.f32 %v1237_v28, %v24_v25  ;;  %v1238_v32 = vmul.f32 %v1783_v29, %v1222_v6  ;;  %v1747_v6 = vld [vmem:[%s2173_s1 + $0x38] ss:$20 sps:$4 sm:$0xff]  }
 0x785   :  { %v1240_v27 = vmul.f32 %v1238_v32, %v24_v25  ;;  %v1241_v34 = vadd.f32 %v1239_v31, %v25_v33  ;;  %v1490_v31 = vld [vmem:[%s2175_s3 + $0x10] ss:$8 sm:$0x3]  ;;  %v1412_v32 = vsub.s32 1, %v1939_v2 }
 0x787   :  { %v1242_v26 = vadd.f32 %v1240_v27, %v25_v33  ;;  %v1409_v33 = vrot.slane %v1490_v31, %v1946_v9  ;;  %v1413_v27 = vrot.slane %v1490_v31, %v1412_v32 }
 0x789   :  { %v1243_v35 = vpack.c.bf16 %v1242_v26, %v1241_v34 }
 0x78b   :  { %1689 = vmatmul.mubr.msk.bf16.vlgmr.msra.gmra.mrb[36].mxu0 %vm118_vm1, %v1243_v35 }
 0x78c   :  { %1440 = vmatpush1.bf16.msra.mxu0 %v1742_v22  ;;  %1471 = vmatprep.mubr.bf16.mxu0 %v1799_v56 }
 0x78d   :  { %1441 = vmatprep.subr.bf16.mxu0 %v1747_v6 }
 0x790   :  { %1442 = vmatpush1.bf16.msra.mxu0 %v1745_v23 }
 0x85e   :  { %v1293_v40 = vpop.f32.mrb[36].mxu0 }
 0x85f   :  { %v1294_v20 = vadd.f32 %v1293_v40, %v21_v38  ;;  %v1690_v41 = vpop.f32.mrb[37].mxu0 }
 0x860   :  { %v1296_v42 = vpop.f32.mrb[38].mxu0 }
 0x861   :  { %v1297_v19 = vadd.f32 %v1296_v42, %v21_v38  ;;  %v1691_v16 = vpop.f32.mrb[39].mxu0  ;;  %v1300_v43 = vmax.f32 %v1294_v20, 0.0 }
 0x863   :  { %v1301_v12 = vmax.f32 %v1297_v19, 0.0 }
 0x865   :  { %v1302_v44 = vpack.c.bf16 %v1301_v12, %v1300_v43 }
 0x867   :  { %1701 = vmatmul.mubr.msk.bf16.vlgmr.msra.gmra.mrb[36].mxu1 %vm1327_vm6, %v1302_v44 }
 0x93a   :  { %v1365_v45 = vpop.f32.mrb[36].mxu1 }
 0x93b   :  { %v1366_v46 = vadd.f32 %v1365_v45, %v23_v0  ;;  %v1702_v47 = vpop.f32.mrb[37].mxu1 }
 0x93c   :  { %v1368_v30 = vpop.f32.mrb[38].mxu1 }
 0x93d   :  { %v1369_v49 = vadd.f32 %v1368_v30, %v23_v0  ;;  %v1703_v39 = vpop.f32.mrb[39].mxu1  ;;  %v1372_v50 = vadd.f32 %v1366_v46, %v1241_v34 }
 0x93f   :  { %v1374_v48 = vsel %vm118_vm1, %v1372_v50, 0.0  ;;  %v1373_v51 = vadd.f32 %v1369_v49, %v1242_v26 }
 0x940   :  { %1375 = vadd.xlane.f32.xlu0 %v1374_v48 }
 0x941   :  { %v1377_v52 = vsel %vm118_vm1, %v1373_v51, 0.0 }
 0x942   :  { %1378 = vadd.xlane.f32.xlu1 %v1377_v52 }
 0x9cd   :  { %v1376_v53 = vpop.xlane.xlu0 %1375 }
 0x9ce   :  { %v1380_v54 = vmul.f32 0.03125, %v1376_v53 }
 0x9cf   :  { %v1379_v55 = vpop.xlane.xlu1 %1378 }
 0x9d0   :  { %v1382_v57 = vsub.f32 %v1372_v50, %v1380_v54  ;;  %v1381_v58 = vmul.f32 0.03125, %v1379_v55 }
 0x9d2   :  { %v1383_v59 = vsub.f32 %v1373_v51, %v1381_v58  ;;  %v1384_v60 = vmul.f32 %v1382_v57, %v1382_v57 }
 0x9d4   :  { %v1386_v61 = vsel %vm118_vm1, %v1384_v60, 0.0  ;;  %v1385_v62 = vmul.f32 %v1383_v59, %v1383_v59 }
 0x9d5   :  { %1387 = vadd.xlane.f32.xlu0 %v1386_v61 }
 0x9d6   :  { %v1389_v63 = vsel %vm118_vm1, %v1385_v62, 0.0 }
 0x9d7   :  { %1390 = vadd.xlane.f32.xlu1 %v1389_v63 }
 0xa62   :  { %v1388_v1 = vpop.xlane.xlu0 %1387 }
 0xa63   :  { %v1392_v7 = vmul.f32 0.03125, %v1388_v1 }
 0xa64   :  { %v1391_v3 = vpop.xlane.xlu1 %1390 }
 0xa65   :  { %v1394_v4 = vadd.f32 1e-05, %v1392_v7  ;;  %v1393_v8 = vmul.f32 0.03125, %v1391_v3 }
 0xa67   :  { %1784 = vrsqrt.f32 %v1394_v4  ;;  %v1395_v10 = vadd.f32 1e-05, %v1393_v8 }
 0xa69   :  { %1786 = vrsqrt.f32 %v1395_v10 }
 0xa71   :  { %v1785_v11 = vpop.eup %1784 }
 0xa72   :  { %v1398_v14 = vmul.f32 %v1785_v11, %v1382_v57 }
 0xa73   :  { %v1787_v15 = vpop.eup %1786 }
 0xa74   :  { %v1400_v17 = vmul.f32 %v1398_v14, %v26_v13  ;;  %v1399_v18 = vmul.f32 %v1787_v15, %v1383_v59 }
 0xa76   :  { %v1401_v24 = vmul.f32 %v1399_v18, %v26_v13  ;;  %v1402_v25 = vadd.f32 %v1400_v17, %v27_v21 }
 0xa78   :  { %v1403_v28 = vadd.f32 %v1401_v24, %v27_v21 }
 0xa7a   :  { %v1404_v29 = vpack.c.bf16 %v1403_v28, %v1402_v25 }
 0xa7c   :  { %1525 = vmatmul.mubr.msk.bf16.vlgmr.msra.gmra.mrb[40].mxu0 %vm118_vm1, %v1404_v29 }
 0xb4f   :  { %v1473_v34 = vpop.f32.mrb[40].mxu0 }
 0xb50   :  { %v1474_v26 = vadd.f32 %v1473_v34, %v1409_v33  ;;  %v1475_v35 = vpop.f32.mrb[41].mxu0 }
 0xb51   :  { %v1476_v36 = vadd.f32 %v1475_v35, %v1413_v27  ;;  %v1477_v37 = vpop.f32.mrb[42].mxu0 }
 0xb52   :  { %1482 = vst [vmem:[%s2177_s4] sm:$0xff] %v1474_v26  ;;  %v1478_v38 = vadd.f32 %v1477_v37, %v1409_v33  ;;  %v1479_v40 = vpop.f32.mrb[43].mxu0 }
 0xb53   :  { %1483 = vst [vmem:[%s2177_s4 + $0x8] sm:$0xff] %v1476_v36  ;;  %v1480_v20 = vadd.f32 %v1479_v40, %v1413_v27 }
 0xb54   :  { %1484 = vst [vmem:[%s2177_s4 + $0x10] sm:$0xff] %v1478_v38 }
 0xb55   :  { %1485 = vst [vmem:[%s2177_s4 + $0x18] sm:$0xff] %v1480_v20 }

</bundles_post_ra>
